<compile_context>
chip_gen: v5e
topology: v5e:2x2
jax: 0.10.0
libtpu: 0.0.40
codegen_flags: <defaults>
</compile_context>

<pallas_src>
import math

import jax
import jax.numpy as jnp
from jax.experimental import pallas as pl
from jax.experimental.pallas import tpu as pltpu


# The weight / bias blocks use a constant index_map, so the pipeline fetches them once
# but still allocates the default two VMEM buffers; account for the real count.
W_BUFS = 2


def _round_up(x, m):
    return (x + m - 1) // m * m


def _device_kind():
    try:
        return jax.devices()[0].device_kind.lower()
    except Exception:
        return ""


def _vmem_budget_bytes(kind):
    """Scoped-VMEM budget with headroom under the physical per-TensorCore cap."""
    if "v7" in kind:                      # v7x: 64 MiB VMEM per TensorCore
        return 48 * 1024 * 1024
    return 96 * 1024 * 1024               # v5e / v6e: 128 MiB physical VMEM


def _num_tensorcores(kind):
    """Chips whose TensorCores are fed by sharding 'parallel' grid axes."""
    return 2 if any(t in kind for t in ("v7", "v5p", "v4")) else 1


def _mxu_m(kind):
    """Row-tile rounding granularity: 256 on v6e/v7x (2x256x256 MXU); none on v5e."""
    return 256 if ("v6" in kind or "v7" in kind) else 0


def _sublane_align(itemsize):
    # f32 -> 8 rows, bf16 -> 16 rows, 8-bit -> 32 rows (sublane packing).
    return 8 * max(1, 4 // itemsize)


def node_apply_kernel(x_ref, w_ref, b_ref, o_ref):
    # MXU matmul with f32 accumulation; bias + ReLU stay in f32 (VPU filler under the
    # MXU / DMA critical path) before the final cast to the output dtype.
    h = jnp.dot(x_ref[...], w_ref[...], preferred_element_type=jnp.float32)
    h = h + b_ref[...].astype(jnp.float32)
    o_ref[...] = jnp.maximum(h, 0.0).astype(o_ref.dtype)


def _pick_tile_n(n_rows, x_cols, out_cols, x_bytes, out_bytes, w_fixed_bytes,
                 budget, sub, num_cores, mxu_m):
    """Row tile sized against the VMEM budget, targeting ~4 MiB of tile traffic per
    grid step (amortizes the ~0.35 us/step pipeline overhead). Returns None when the
    resident weight slab leaves no room even for a minimal row tile."""
    per_row = 2 * (x_cols * x_bytes + out_cols * out_bytes)   # double-buffered x + out
    avail = budget - w_fixed_bytes
    if avail < per_row * sub:
        return None
    vmem_rows = (avail // per_row) // sub * sub
    target_rows = _round_up(max(sub, (4 * 1024 * 1024) // max(1, per_row // 2)), sub)
    tile = min(vmem_rows, target_rows)
    # Dual-TensorCore chips: keep >= num_cores row blocks so the "parallel" axis
    # shards across both cores instead of leaving one idle.
    if num_cores > 1 and n_rows >= 2 * num_cores * sub:
        tile = min(tile, _round_up(pl.cdiv(n_rows, num_cores), sub))
    if mxu_m and tile >= 2 * mxu_m:
        tile -= tile % mxu_m
    tile -= tile % sub
    tile = max(tile, sub)
    return n_rows if tile >= n_rows else tile


def _pick_tile_cols(in_feats, out_feats, w_bytes, budget):
    """Column (out_feats) tile for weights too large to keep fully VMEM-resident:
    largest multiple of 128 whose double-buffered weight slab fits in ~half the budget."""
    slab_budget = budget // 2
    cols = (slab_budget // max(1, in_feats * w_bytes * W_BUFS)) // 128 * 128
    if cols < 128:
        return None
    return min(cols, _round_up(out_feats, 128))


def node_apply(x, weight, bias, *, tile_n=None, tile_out=None,
               compute_dtype=None, out_dtype=None):
    """relu(x @ weight + bias) — NodeApplyModule forward as a Pallas TPU kernel.

    x:      (N, in_feats)          node features
    weight: (in_feats, out_feats)  torch nn.Linear weight, transposed
    bias:   (out_feats,)
    compute_dtype: optional cast for x/weight (e.g. bf16); MXU still accumulates f32.
    out_dtype:     optional output dtype (e.g. bf16 to halve output HBM writes).
    The wrapper is jit-friendly; in a real model, cast/stage the parameters once.
    """
    N, in_feats = x.shape
    assert weight.shape[0] == in_feats and bias.shape == (weight.shape[1],)
    out_feats = weight.shape[1]
    if out_dtype is None:
        out_dtype = x.dtype                      # keep the module's output dtype

    if compute_dtype is not None:
        x = x.astype(compute_dtype)
        weight = weight.astype(compute_dtype)
    bias2d = bias.astype(jnp.float32).reshape(1, out_feats)   # f32 epilogue bias

    kind = _device_kind()
    budget = _vmem_budget_bytes(kind)
    num_cores = _num_tensorcores(kind)
    mxu_m = _mxu_m(kind)

    x_bytes = jnp.dtype(x.dtype).itemsize
    w_bytes = jnp.dtype(weight.dtype).itemsize
    o_bytes = jnp.dtype(out_dtype).itemsize
    sub = max(_sublane_align(x_bytes), _sublane_align(o_bytes))

    # --- weight residency: whole weight VMEM-resident vs. column-tiled weight slabs.
    if tile_out is None:
        w_resident = in_feats * out_feats * w_bytes * W_BUFS
        if w_resident > budget // 2:             # generation-aware gate (v7x vs v6e/v5e)
            tile_out = _pick_tile_cols(in_feats, out_feats, w_bytes, budget)
            if tile_out is None:
                # TODO(synk): add an in_feats (K) grid axis with an f32 VMEM accumulator
                # (pl.when init/finalize) for weights whose single 128-column slab still
                # exceeds the VMEM budget.
                raise NotImplementedError(
                    "NodeApplyModule weight too large for VMEM even with 128-column "
                    "tiling; K-tiled accumulation not implemented.")
    if tile_out is not None:
        tile_out = out_feats if tile_out >= out_feats else _round_up(tile_out, 128)
        if tile_out >= out_feats:
            tile_out = None                      # one column block == no column tiling

    blk_out = out_feats if tile_out is None else tile_out
    w_fixed = in_feats * blk_out * w_bytes * W_BUFS + W_BUFS * blk_out * 4   # weight + bias

    if tile_n is None:
        tile_n = _pick_tile_n(N, in_feats, blk_out, x_bytes, o_bytes, w_fixed,
                              budget, sub, num_cores, mxu_m)
        if tile_n is None:
            raise NotImplementedError(
                "row tile does not fit beside the weight slab in VMEM; "
                "K-tiled accumulation not implemented.")
    tile_n = max(_round_up(tile_n, sub), sub)
    if tile_n >= N:
        tile_n = N                               # single full-extent row block (legal)

    grid_rows = pl.cdiv(N, tile_n)

    if tile_out is None:
        # 1-D grid over node rows; weight/bias fully VMEM-resident (constant index_map
        # -> fetched once, never re-DMA'd across grid steps).
        grid = (grid_rows,)
        in_specs = [
            pl.BlockSpec((tile_n, in_feats), lambda i: (i, 0)),
            pl.BlockSpec((in_feats, out_feats), lambda i: (0, 0)),
            pl.BlockSpec((1, out_feats), lambda i: (0, 0)),
        ]
        out_spec = pl.BlockSpec((tile_n, out_feats), lambda i: (i, 0))
        dims = ("parallel",)
    else:
        # 2-D grid: rows x out_feats column slabs (weight too large to stay resident).
        grid = (grid_rows, pl.cdiv(out_feats, tile_out))
        in_specs = [
            pl.BlockSpec((tile_n, in_feats), lambda i, j: (i, 0)),
            pl.BlockSpec((in_feats, tile_out), lambda i, j: (0, j)),
            pl.BlockSpec((1, tile_out), lambda i, j: (0, j)),
        ]
        out_spec = pl.BlockSpec((tile_n, tile_out), lambda i, j: (i, j))
        dims = ("parallel", "parallel")

    call = pl.pallas_call(
        node_apply_kernel,
        out_shape=jax.ShapeDtypeStruct((N, out_feats), out_dtype),   # unpadded output
        grid_spec=pltpu.PrefetchScalarGridSpec(
            num_scalar_prefetch=0,
            grid=grid,
            in_specs=in_specs,
            out_specs=out_spec,
        ),
        compiler_params=pltpu.CompilerParams(
            dimension_semantics=dims,
            vmem_limit_bytes=budget,
        ),
    )
    return call(x, weight, bias2d)


if __name__ == "__main__":
    # Small, module-consistent shapes: N nodes, in_feats -> out_feats GCN layer.
    def init(key, n, fin, fout):
        kx, kw, kb = jax.random.split(key, 3)
        bound = 1.0 / math.sqrt(fin)    # nn.Linear default init range
        x = jax.random.normal(kx, (n, fin), dtype=jnp.float32)
        w = jax.random.uniform(kw, (fin, fout), jnp.float32, -bound, bound)
        b = jax.random.uniform(kb, (fout,), jnp.float32, -bound, bound)
        return x, w, b

    def ref_fn(x, w, b):
        return jnp.maximum(x @ w + b[None, :], 0.0)

    # 1) f32 path, default tiling policy, jit-wrapped wrapper (no eager pad/slice ops).
    x, w, b = init(jax.random.PRNGKey(0), 8, 32, 32)
    apply_jit = jax.jit(node_apply,
                        static_argnames=("tile_n", "tile_out",
                                         "compute_dtype", "out_dtype"))
    out = jax.block_until_ready(apply_jit(x, w, b))
    assert out.shape == (8, 32)
    assert jnp.allclose(out, ref_fn(x, w, b), atol=1e-4, rtol=1e-4), "f32 mismatch"

    # 2) bf16 inputs + bf16 output (f32 MXU accumulation, f32 bias+ReLU epilogue).
    out_bf16 = jax.block_until_ready(
        node_apply(x, w, b, compute_dtype=jnp.bfloat16, out_dtype=jnp.bfloat16))
    assert out_bf16.dtype == jnp.bfloat16
    assert jnp.allclose(out_bf16.astype(jnp.float32), ref_fn(x, w, b),
                        atol=5e-2, rtol=5e-2), "bf16 mismatch"

    # 3) Ragged N with a multi-block row grid (masked partial last row block, no padding).
    x3, w3, b3 = init(jax.random.PRNGKey(1), 40, 32, 48)
    out3 = jax.block_until_ready(node_apply(x3, w3, b3, tile_n=16))
    assert out3.shape == (40, 48)
    assert jnp.allclose(out3, ref_fn(x3, w3, b3), atol=1e-4, rtol=1e-4), "ragged-N mismatch"

    # 4) Forced column-tiled weight path (2-D grid, masked partial last column block).
    x4, w4, b4 = init(jax.random.PRNGKey(2), 24, 64, 200)
    out4 = jax.block_until_ready(node_apply(x4, w4, b4, tile_n=8, tile_out=128))
    assert out4.shape == (24, 200)
    assert jnp.allclose(out4, ref_fn(x4, w4, b4), atol=1e-4, rtol=1e-4), "col-tiled mismatch"

    print("KERNEL_OK")
</pallas_src>

<mosaic_0001>
module attributes {stable_mosaic.version = 11 : i64} {
  func.func @node_apply_kernel(%arg0: i32, %arg1: memref<8x32xf32, #tpu.memory_space<vmem>>, %arg2: memref<32x32xf32, #tpu.memory_space<vmem>>, %arg3: memref<1x32xf32, #tpu.memory_space<vmem>>, %arg4: memref<8x32xf32, #tpu.memory_space<vmem>>) attributes {dimension_semantics = [#tpu.dimension_semantics<parallel>], iteration_bounds = array<i64: 1>, scalar_prefetch = 0 : i64, scratch_operands = 0 : i64, tpu.core_type = #tpu.core_type<tc>, window_params = [{transform_indices = @transform_0, window_bounds = array<i64: 8, 32>}, {pipeline_mode = #tpu.pipeline_mode<synchronous>, transform_indices = @transform_1, window_bounds = array<i64: 32, 32>}, {pipeline_mode = #tpu.pipeline_mode<synchronous>, transform_indices = @transform_2, window_bounds = array<i64: 1, 32>}, {transform_indices = @transform_3, window_bounds = array<i64: 8, 32>}]} {
    %c0 = arith.constant 0 : index
    %c0_0 = arith.constant 0 : index
    %0 = vector.load %arg1[%c0, %c0_0] : memref<8x32xf32, #tpu.memory_space<vmem>>, vector<8x32xf32>
    %c0_1 = arith.constant 0 : index
    %c0_2 = arith.constant 0 : index
    %1 = vector.load %arg2[%c0_1, %c0_2] : memref<32x32xf32, #tpu.memory_space<vmem>>, vector<32x32xf32>
    %cst = arith.constant dense<0.000000e+00> : vector<8x32xf32>
    %2 = tpu.matmul %0, %1, %cst {dimension_numbers = #tpu.dot_dimension_numbers<[1], [0], [0], [1], [0, 0, 1, 1], [], []>} : vector<8x32xf32>, vector<32x32xf32>, vector<8x32xf32> -> vector<8x32xf32>
    %c0_3 = arith.constant 0 : index
    %c0_4 = arith.constant 0 : index
    %3 = vector.load %arg3[%c0_3, %c0_4] : memref<1x32xf32, #tpu.memory_space<vmem>>, vector<1x32xf32>
    %4 = vector.broadcast %3 : vector<1x32xf32> to vector<8x32xf32>
    %5 = arith.addf %2, %4 : vector<8x32xf32>
    %cst_5 = arith.constant 0.000000e+00 : f32
    %6 = vector.broadcast %cst_5 : f32 to vector<8x32xf32>
    %7 = arith.maximumf %5, %6 : vector<8x32xf32>
    %c0_6 = arith.constant 0 : index
    %c0_7 = arith.constant 0 : index
    %8 = vector.load %arg4[%c0_6, %c0_7] : memref<8x32xf32, #tpu.memory_space<vmem>>, vector<8x32xf32>
    tpu.vector_store %arg4[%c0_6, %c0_7], %7 {strides = array<i32>} : memref<8x32xf32, #tpu.memory_space<vmem>>, vector<8x32xf32>,
    return
  }
  func.func @transform_0(%arg0: i32) -> (i32, i32) {
    %c0_i32 = arith.constant 0 : i32
    %c0_i32_0 = arith.constant 0 : i32
    return %arg0, %c0_i32 : i32, i32
  }
  func.func @transform_1(%arg0: i32) -> (i32, i32) {
    %c0_i32 = arith.constant 0 : i32
    %c0_i32_0 = arith.constant 0 : i32
    %c0_i32_1 = arith.constant 0 : i32
    return %c0_i32, %c0_i32_0 : i32, i32
  }
  func.func @transform_2(%arg0: i32) -> (i32, i32) {
    %c0_i32 = arith.constant 0 : i32
    %c0_i32_0 = arith.constant 0 : i32
    %c0_i32_1 = arith.constant 0 : i32
    return %c0_i32, %c0_i32_0 : i32, i32
  }
  func.func @transform_3(%arg0: i32) -> (i32, i32) {
    %c0_i32 = arith.constant 0 : i32
    %c0_i32_0 = arith.constant 0 : i32
    return %arg0, %c0_i32 : i32, i32
  }
}

</mosaic_0001>

<bundles_post_ra>
// kernel: node_apply.1
= control target key start
LH: loop header
LB: loop body
LE: loop exit
PB: predicated region body
PF: predicated region fallthrough
CT: control target
= control target key end

     0   :  { %8 = vsyncpa [#allocation3], 0  ;;  %s220_s0 = inlined_call_operand.hbm [shape: f32[8,32], index: 0, kind: input, shape index: {}]   ;;  %s221_s1 = inlined_call_operand.hbm [shape: f32[32,32], index: 1, kind: input, shape index: {}]   ;;  %s222_s2 = inlined_call_operand.vmem [shape: f32[1,32], index: 2, kind: input, shape index: {}]   ;;  %s223_s3 = inlined_call_operand.hbm [shape: f32[8,32], index: 3, kind: output, shape index: {}]  }
   0x1   :  { %9 = vsyncpa [#allocation6], 0 }
   0x2   :  { %10 = vsyncpa [#allocation4], 0  ;;  %s16_s14 = sshll.u32 %s220_s0, 4  ;;  %s183_s15 = smov [#allocation2]   ;;  %s17_s14 = int_to_ptr.hbm [resolvable:$true] %s16_s14 }
   0x3   :  { %s18_s16 = sshll.u32 %s183_s15, 4  ;;  %s26_s19 = sshll.u32 %s221_s1, 4  ;;  %s19_s16 = int_to_ptr.vmem [resolvable:$true] %s18_s16  ;;  %s27_s19 = int_to_ptr.hbm [resolvable:$true] %s26_s19 }
   0x4   :  { %21 = dma.hbm_to_vmem [thread:$0]  %s17_s14, 128, %s19_s16, [#allocation3]  }
   0x5   :  { %s184_s20 = smov [#allocation5]   ;;  %s185_s22 = smov 128  }
   0x6   :  { %s28_s21 = sshll.u32 %s184_s20, 4  ;;  %s186_s23 = smov 8   ;;  %s29_s21 = int_to_ptr.vmem [resolvable:$true] %s28_s21 }
   0x7   :  { %34 = dma.hbm_to_vmem [thread:$0]  %s27_s19, 512, %s29_s21, [#allocation6], %s185_s22, %s185_s22, %s186_s23  }
   0x8   :  { %177 = dma.done.wait [#allocation3], 128  }
   0x9   :  { %178 = vsyncadd [#allocation3], 4294967168 }
   0xa   :  { %179 = dma.done.wait [#allocation6], 512  }
   0xb   :  { %180 = vsyncadd [#allocation6], 4294966784  ;;  %v49_v0 = vld [vmem:[#allocation5 + $0x18] sm:$0xff]  ;;  %v48_v1 = vld [vmem:[#allocation5 + $0x10] sm:$0xff]  ;;  %vm54_vm0 = vcmask 261120   ;;  %s187_s24 = smov [#allocation7]  }
   0xc   :  { %70 = vmatpush.msra.mxu0 %v49_v0  ;;  %v47_v2 = vld [vmem:[#allocation5 + $0x8] sm:$0xff]  ;;  %v46_v3 = vld [vmem:[#allocation5] sm:$0xff]  ;;  %v45_v4 = vld [vmem:[#allocation2] sm:$0xff]  ;;  %s85_s25 = sshll.u32 %s187_s24, 4  ;;  %s87_s28 = sshll.u32 %s223_s3, 4  ;;  %s86_s25 = int_to_ptr.vmem [resolvable:$true] %s85_s25  ;;  %s88_s28 = int_to_ptr.hbm [resolvable:$true] %s87_s28 }
   0xd   :  { %v104_v5 = vld [vmem:[%s222_s2] ss:$0 sm:$0xff] }
   0xe   :  { %71 = vmatpush.msra.mxu0 %v48_v1 }
  0x10   :  { %72 = vmatpush.msra.mxu0 %v47_v2 }
  0x12   :  { %73 = vmatpush.msra.mxu0 %v46_v3 }
  0x13   :  { %98 = vmatmul.msk.f32.vlgmr.msra.gmra.mxu0 %vm54_vm0, %v45_v4 }
  0x90   :  { %v75_v6 = vpop.f32.mrf.mxu0 }
  0x91   :  { %v76_v7 = vadd.f32 %v104_v5, %v75_v6 }
  0x93   :  { %v78_v8 = vmax.f32 %v76_v7, 0.0 }
  0x95   :  { %79 = vst.msk [vmem:[#allocation7] sm:$0xff] %vm54_vm0, %v78_v8 }
  0x96   :  { %90 = dma.vmem_to_hbm [thread:$0]  %s86_s25, 128, %s88_s28, [#allocation4]  }
  0x97   :  { %181 = dma.done.wait [#allocation4], 128  }
  0x98   :  { %182 = vsyncadd [#allocation4], 4294967168 }
  0x99   :  { %95 = vsyncpa [#allocation3], 1 }
  0x9a   :  { %96 = vsyncpa [#allocation6], 1 }
  0x9b   :  { %97 = vsyncpa [#allocation4], 1 }

</bundles_post_ra>
